<compile_context>
chip_gen: v5e
topology: v5e:2x2
jax: 0.10.0
libtpu: 0.0.40
codegen_flags: <defaults>
</compile_context>

<pallas_src>
import functools

import jax
import jax.numpy as jnp
from jax import lax
from jax.experimental import pallas as pl
from jax.experimental.pallas import tpu as pltpu


_MIN_TILE = 128
_TARGET_BLOCK_BYTES = 8 * 1024 * 1024   # ~8 MiB per input block (HBM-bound regime)


def _round_up(v, m):
    return ((v + m - 1) // m) * m


def _cdiv(a, b):
    return (a + b - 1) // b


@functools.lru_cache(maxsize=None)
def _vmem_capacity_bytes():
    """Per-core VMEM capacity; conservative fallback is v7x's 64 MiB."""
    try:
        cap = int(getattr(pltpu.get_tpu_info(), "vmem_capacity_bytes", 0))
        if cap > 0:
            return cap
    except Exception:
        pass
    return 64 * 1024 * 1024


@functools.lru_cache(maxsize=None)
def _num_tensorcores():
    """TensorCores per device: 2 on v7x, 1 on v5e/v6e (best-effort detection)."""
    try:
        kind = jax.devices()[0].device_kind.lower()
    except Exception:
        return 1
    return 2 if ("v7" in kind or "7x" in kind) else 1


def _scoped_vmem_limit_bytes():
    cap = _vmem_capacity_bytes()
    # ~48 MiB on v7x (64 MiB physical), ~96 MiB on v5e/v6e (128 MiB physical).
    return max(32 * 1024 * 1024, min((cap * 3) // 4, 96 * 1024 * 1024))


def _pick_tile_and_bufs(n, f, itemsize, *, center_in_kernel, vmem_limit_bytes):
    """Largest lane tile whose full VMEM footprint fits the scoped budget."""
    f128 = _round_up(f, 128)
    acc_bytes = 2 * n * n * 4                 # (N, N) f32 output block, assume 2 buffers
    usable = int(vmem_limit_bytes * 0.85) - acc_bytes   # headroom for compiler internals

    def budget_tile(n_bufs):
        per_lane = n_bufs * n * itemsize      # pipelined native-dtype input buffers
        if center_in_kernel:
            per_lane += 2 * n * 4             # in-kernel f32 x / xc temporaries
        return max(usable, 0) // per_lane

    if budget_tile(2) < _MIN_TILE:
        raise NotImplementedError(
            "CKALoss Pallas kernel: the (N, N) Gram accumulator plus a minimal "
            f"(N, 128) feature block does not fit scoped VMEM for N={n}. "
            "TODO(synk): add an (i, j)-tiled output path for very large N.")

    n_bufs = 2
    by_budget = budget_tile(n_bufs)
    by_target = max(_TARGET_BLOCK_BYTES // (n * itemsize), _MIN_TILE)
    tile = min(by_budget, by_target, f128)
    tile = max(_MIN_TILE, (tile // _MIN_TILE) * _MIN_TILE)

    # If the VMEM budget (not the feature extent / block target) limited the
    # tile and steps are numerous, trade one extra buffer for deeper pipelining.
    steps = _cdiv(f128, tile)
    if by_budget < min(by_target, f128) and steps >= 8:
        t3 = min(budget_tile(3), by_target, f128)
        t3 = (t3 // _MIN_TILE) * _MIN_TILE
        if t3 >= _MIN_TILE:
            n_bufs, tile = 3, t3

    return tile, n_bufs


def _make_gram_kernel(center_in_kernel, reduce_axis):
    def kernel(x_ref, g_ref):
        @pl.when(pl.program_id(reduce_axis) == 0)
        def _():
            g_ref[...] = jnp.zeros_like(g_ref)

        x = x_ref[...]                                   # (N, tile), native dtype
        if center_in_kernel:
            # Exact per-tile column centering (each feature column lives fully
            # inside one tile); zero-padded columns stay zero.
            x = x.astype(jnp.float32)
            x = x - jnp.mean(x, axis=0, keepdims=True)

        # (N, tile) x (N, tile) contracting the lane (feature) axis -> (N, N).
        # No explicit transpose; native-dtype operands feed the MXU directly,
        # accumulation stays f32.
        g_ref[...] += lax.dot_general(
            x, x,
            dimension_numbers=(((1,), (1,)), ((), ())),
            preferred_element_type=jnp.float32,
        )

    return kernel


def _gram(xf, *, center_in_kernel):
    """N x N Gram matrix (centered iff center_in_kernel) via a Pallas kernel."""
    n, f = xf.shape
    itemsize = jnp.dtype(xf.dtype).itemsize

    vmem_limit = _scoped_vmem_limit_bytes()
    tile, n_bufs = _pick_tile_and_bufs(
        n, f, itemsize,
        center_in_kernel=center_in_kernel,
        vmem_limit_bytes=vmem_limit)

    # Split the feature range across TensorCores only when the chip has >1 TC
    # (v7x); on single-TC v5e/v6e this would only add overhead.
    p = _num_tensorcores()
    steps_total = _cdiv(f, tile)
    if p > 1 and steps_total >= p:
        steps_total = _round_up(steps_total, p)
    else:
        p = 1
    # Shrink the tile to minimize zero padding while keeping the step count.
    tile = _round_up(_cdiv(f, steps_total), _MIN_TILE)
    steps = steps_total // p
    f_padded = steps_total * tile

    if f_padded != f:
        # Zero columns contribute nothing to X X^T (and center to zero), so
        # padding is exact for both kernel variants.
        xf = jnp.pad(xf, ((0, 0), (0, f_padded - f)))

    in_bytes = n * f_padded * itemsize
    out_bytes = p * n * n * 4
    cost = pl.CostEstimate(flops=2 * n * n * f_padded, transcendentals=0,
                           bytes_accessed=in_bytes + out_bytes)

    if p == 1:
        in_map = lambda ki: (0, ki)
        if n_bufs > 2:
            in_spec = pl.BlockSpec((n, tile), in_map,
                                   pipeline_mode=pl.Buffered(n_bufs))
        else:
            in_spec = pl.BlockSpec((n, tile), in_map)

        return pl.pallas_call(
            _make_gram_kernel(center_in_kernel, reduce_axis=0),
            out_shape=jax.ShapeDtypeStruct((n, n), jnp.float32),
            grid_spec=pltpu.PrefetchScalarGridSpec(
                num_scalar_prefetch=0,
                grid=(steps_total,),
                in_specs=[in_spec],
                out_specs=pl.BlockSpec((n, n), lambda ki: (0, 0)),
            ),
            compiler_params=pltpu.CompilerParams(
                dimension_semantics=("arbitrary",),
                vmem_limit_bytes=vmem_limit,
            ),
            cost_estimate=cost,
        )(xf)

    # Multi-TensorCore (v7x) path: leading CORE_PARALLEL axis, one feature
    # chunk and one partial (N, N) Gram per core, summed in the wrapper.
    in_map = lambda pi, ki: (0, pi * steps + ki)
    if n_bufs > 2:
        in_spec = pl.BlockSpec((n, tile), in_map,
                               pipeline_mode=pl.Buffered(n_bufs))
    else:
        in_spec = pl.BlockSpec((n, tile), in_map)

    partial = pl.pallas_call(
        _make_gram_kernel(center_in_kernel, reduce_axis=1),
        out_shape=jax.ShapeDtypeStruct((p, n, n), jnp.float32),
        grid_spec=pltpu.PrefetchScalarGridSpec(
            num_scalar_prefetch=0,
            grid=(p, steps),
            in_specs=[in_spec],
            out_specs=pl.BlockSpec((None, n, n), lambda pi, ki: (pi, 0, 0)),
        ),
        compiler_params=pltpu.CompilerParams(
            dimension_semantics=(pltpu.CORE_PARALLEL, pltpu.ARBITRARY),
            vmem_limit_bytes=vmem_limit,
        ),
        cost_estimate=cost,
    )(xf)
    return jnp.sum(partial, axis=0)


def _double_center(g):
    """K = H G H for the (tiny) raw Gram matrix G, in f32."""
    col = jnp.mean(g, axis=0, keepdims=True)
    row = jnp.mean(g, axis=1, keepdims=True)
    grand = jnp.mean(col)
    return g - col - row + grand


@functools.partial(jax.jit, static_argnames=("center_in_kernel",))
def cka_loss(x, y, *, center_in_kernel=None):
    """Linear-kernel CKA between x and y (NCHW or any (N, ...) tensors).

    Equivalent to CKALoss(kernel_method='linear')(x, y) in the PyTorch module:
        CKA = ||Xc^T Yc||_F^2 / (||Xc^T Xc||_F * ||Yc^T Yc||_F)
            = <Kx, Ky>_F / (||Kx||_F * ||Ky||_F)   with K* the centered Grams.

    center_in_kernel=None (auto): exact in-kernel column centering for f32
    inputs; raw Gram + wrapper double-centering (K = H G H) for lower-precision
    dtypes so the MXU is fed native bf16/f16 directly.
    """
    n = x.shape[0]
    assert y.shape[0] == n, "x and y must have the same number of examples"

    xf = jnp.reshape(x, (n, -1))       # keep native dtype in HBM
    yf = jnp.reshape(y, (n, -1))

    def centered_gram(f):
        cik = center_in_kernel
        if cik is None:
            cik = jnp.dtype(f.dtype) == jnp.dtype(jnp.float32)
        g = _gram(f, center_in_kernel=bool(cik))
        return g if cik else _double_center(g)

    kx = centered_gram(xf)
    ky = centered_gram(yf)

    s_xy = jnp.sum(kx * ky)            # == ||Xc^T Yc||_F^2
    s_xx = jnp.sum(kx * kx)            # == ||Xc^T Xc||_F^2
    s_yy = jnp.sum(ky * ky)            # == ||Yc^T Yc||_F^2
    # NOTE: like the PyTorch reference, this divides by zero if either input
    # has all-constant features (no eps guard, to preserve semantics).
    return s_xy / (jnp.sqrt(s_xx) * jnp.sqrt(s_yy))


def _reference_cka(x, y):
    """Pure-JAX transcription of feature_space_linear_cka (debiased=False)."""
    n = x.shape[0]
    xf = jnp.reshape(x, (n, -1)).astype(jnp.float32)
    yf = jnp.reshape(y, (n, -1)).astype(jnp.float32)
    xc = xf - jnp.mean(xf, axis=0, keepdims=True)
    yc = yf - jnp.mean(yf, axis=0, keepdims=True)
    dps = jnp.sum((xc.T @ yc) ** 2)
    nx = jnp.sqrt(jnp.sum((xc.T @ xc) ** 2))
    ny = jnp.sqrt(jnp.sum((yc.T @ yc) ** 2))
    return dps / (nx * ny)


if __name__ == "__main__":
    key = jax.random.PRNGKey(0)
    kx_key, ky_key = jax.random.split(key)

    # NCHW inputs, flattened inside the wrapper (x.view(N, -1) semantics).
    x = jax.random.normal(kx_key, (8, 4, 16, 16), dtype=jnp.float32)   # F = 1024
    y = jax.random.normal(ky_key, (8, 8, 16, 16), dtype=jnp.float32)   # F = 2048

    # f32 path: exact in-kernel column centering.
    result = jax.block_until_ready(cka_loss(x, y))
    ref = jax.block_until_ready(_reference_cka(x, y))
    assert jnp.isfinite(result), "CKA result is not finite"
    assert abs(float(result) - float(ref)) < 1e-4, (
        f"f32 mismatch: kernel={float(result)} ref={float(ref)}")

    # bf16 path: raw Gram on native bf16 blocks + wrapper H G H centering.
    xb = x.astype(jnp.bfloat16)
    yb = y.astype(jnp.bfloat16)
    result_b = jax.block_until_ready(cka_loss(xb, yb))
    ref_b = jax.block_until_ready(_reference_cka(xb, yb))
    assert jnp.isfinite(result_b), "bf16 CKA result is not finite"
    assert abs(float(result_b) - float(ref_b)) < 3e-2, (
        f"bf16 mismatch: kernel={float(result_b)} ref={float(ref_b)}")

    print("KERNEL_OK")
</pallas_src>

<mosaic_0001>
module attributes {stable_mosaic.version = 11 : i64} {
  func.func @kernel(%arg0: i32, %arg1: memref<8x1024xf32, #tpu.memory_space<vmem>>, %arg2: memref<8x8xf32, #tpu.memory_space<vmem>>) attributes {dimension_semantics = [#tpu.dimension_semantics<arbitrary>], iteration_bounds = array<i64: 1>, scalar_prefetch = 0 : i64, scratch_operands = 0 : i64, tpu.core_type = #tpu.core_type<tc>, window_params = [{transform_indices = @transform_0, window_bounds = array<i64: 8, 1024>}, {pipeline_mode = #tpu.pipeline_mode<synchronous>, transform_indices = @transform_1, window_bounds = array<i64: 8, 8>}]} {
    %c0_i32 = arith.constant 0 : i32
    %0 = arith.cmpi eq, %arg0, %c0_i32 : i32
    %1 = arith.extui %0 : i1 to i32
    %c0_i32_0 = arith.constant 0 : i32
    %2 = arith.cmpi ne, %1, %c0_i32_0 : i32
    scf.if %2 {
      %cst_8 = arith.constant 0.000000e+00 : f32
      %14 = vector.broadcast %cst_8 : f32 to vector<8x8xf32>
      %c0_9 = arith.constant 0 : index
      %c0_10 = arith.constant 0 : index
      %15 = vector.load %arg2[%c0_9, %c0_10] : memref<8x8xf32, #tpu.memory_space<vmem>>, vector<8x8xf32>
      tpu.vector_store %arg2[%c0_9, %c0_10], %14 {strides = array<i32>} : memref<8x8xf32, #tpu.memory_space<vmem>>, vector<8x8xf32>,
    } else {
    }
    %c0 = arith.constant 0 : index
    %c0_1 = arith.constant 0 : index
    %3 = vector.load %arg1[%c0, %c0_1] : memref<8x1024xf32, #tpu.memory_space<vmem>>, vector<8x1024xf32>
    %cst = arith.constant dense<0.000000e+00> : vector<1024xf32>
    %4 = vector.multi_reduction <add>, %3, %cst [0] : vector<8x1024xf32> to vector<1024xf32>
    %5 = vector.shape_cast %4 : vector<1024xf32> to vector<1x1024xf32>
    %cst_2 = arith.constant 8.000000e+00 : f32
    %6 = vector.broadcast %cst_2 : f32 to vector<1x1024xf32>
    %7 = arith.divf %5, %6 : vector<1x1024xf32>
    %8 = vector.broadcast %7 : vector<1x1024xf32> to vector<8x1024xf32>
    %9 = arith.subf %3, %8 : vector<8x1024xf32>
    %c0_3 = arith.constant 0 : index
    %c0_4 = arith.constant 0 : index
    %10 = vector.load %arg2[%c0_3, %c0_4] : memref<8x8xf32, #tpu.memory_space<vmem>>, vector<8x8xf32>
    %cst_5 = arith.constant dense<0.000000e+00> : vector<8x8xf32>
    %11 = tpu.matmul %9, %9, %cst_5 {dimension_numbers = #tpu.dot_dimension_numbers<[1], [1], [0], [0], [0, 0, 1, 0], [], []>} : vector<8x1024xf32>, vector<8x1024xf32>, vector<8x8xf32> -> vector<8x8xf32>
    %12 = arith.addf %10, %11 : vector<8x8xf32>
    %c0_6 = arith.constant 0 : index
    %c0_7 = arith.constant 0 : index
    %13 = vector.load %arg2[%c0_6, %c0_7] : memref<8x8xf32, #tpu.memory_space<vmem>>, vector<8x8xf32>
    tpu.vector_store %arg2[%c0_6, %c0_7], %12 {strides = array<i32>} : memref<8x8xf32, #tpu.memory_space<vmem>>, vector<8x8xf32>,
    return
  }
  func.func @transform_0(%arg0: i32) -> (i32, i32) {
    %c0_i32 = arith.constant 0 : i32
    %c0_i32_0 = arith.constant 0 : i32
    return %c0_i32, %arg0 : i32, i32
  }
  func.func @transform_1(%arg0: i32) -> (i32, i32) {
    %c0_i32 = arith.constant 0 : i32
    %c0_i32_0 = arith.constant 0 : i32
    %c0_i32_1 = arith.constant 0 : i32
    return %c0_i32, %c0_i32_0 : i32, i32
  }
}

module attributes {stable_mosaic.version = 11 : i64} {
  func.func @kernel(%arg0: i32, %arg1: memref<8x2048xf32, #tpu.memory_space<vmem>>, %arg2: memref<8x8xf32, #tpu.memory_space<vmem>>) attributes {dimension_semantics = [#tpu.dimension_semantics<arbitrary>], iteration_bounds = array<i64: 1>, scalar_prefetch = 0 : i64, scratch_operands = 0 : i64, tpu.core_type = #tpu.core_type<tc>, window_params = [{transform_indices = @transform_0, window_bounds = array<i64: 8, 2048>}, {pipeline_mode = #tpu.pipeline_mode<synchronous>, transform_indices = @transform_1, window_bounds = array<i64: 8, 8>}]} {
    %c0_i32 = arith.constant 0 : i32
    %0 = arith.cmpi eq, %arg0, %c0_i32 : i32
    %1 = arith.extui %0 : i1 to i32
    %c0_i32_0 = arith.constant 0 : i32
    %2 = arith.cmpi ne, %1, %c0_i32_0 : i32
    scf.if %2 {
      %cst_8 = arith.constant 0.000000e+00 : f32
      %14 = vector.broadcast %cst_8 : f32 to vector<8x8xf32>
      %c0_9 = arith.constant 0 : index
      %c0_10 = arith.constant 0 : index
      %15 = vector.load %arg2[%c0_9, %c0_10] : memref<8x8xf32, #tpu.memory_space<vmem>>, vector<8x8xf32>
      tpu.vector_store %arg2[%c0_9, %c0_10], %14 {strides = array<i32>} : memref<8x8xf32, #tpu.memory_space<vmem>>, vector<8x8xf32>,
    } else {
    }
    %c0 = arith.constant 0 : index
    %c0_1 = arith.constant 0 : index
    %3 = vector.load %arg1[%c0, %c0_1] : memref<8x2048xf32, #tpu.memory_space<vmem>>, vector<8x2048xf32>
    %cst = arith.constant dense<0.000000e+00> : vector<2048xf32>
    %4 = vector.multi_reduction <add>, %3, %cst [0] : vector<8x2048xf32> to vector<2048xf32>
    %5 = vector.shape_cast %4 : vector<2048xf32> to vector<1x2048xf32>
    %cst_2 = arith.constant 8.000000e+00 : f32
    %6 = vector.broadcast %cst_2 : f32 to vector<1x2048xf32>
    %7 = arith.divf %5, %6 : vector<1x2048xf32>
    %8 = vector.broadcast %7 : vector<1x2048xf32> to vector<8x2048xf32>
    %9 = arith.subf %3, %8 : vector<8x2048xf32>
    %c0_3 = arith.constant 0 : index
    %c0_4 = arith.constant 0 : index
    %10 = vector.load %arg2[%c0_3, %c0_4] : memref<8x8xf32, #tpu.memory_space<vmem>>, vector<8x8xf32>
    %cst_5 = arith.constant dense<0.000000e+00> : vector<8x8xf32>
    %11 = tpu.matmul %9, %9, %cst_5 {dimension_numbers = #tpu.dot_dimension_numbers<[1], [1], [0], [0], [0, 0, 1, 0], [], []>} : vector<8x2048xf32>, vector<8x2048xf32>, vector<8x8xf32> -> vector<8x8xf32>
    %12 = arith.addf %10, %11 : vector<8x8xf32>
    %c0_6 = arith.constant 0 : index
    %c0_7 = arith.constant 0 : index
    %13 = vector.load %arg2[%c0_6, %c0_7] : memref<8x8xf32, #tpu.memory_space<vmem>>, vector<8x8xf32>
    tpu.vector_store %arg2[%c0_6, %c0_7], %12 {strides = array<i32>} : memref<8x8xf32, #tpu.memory_space<vmem>>, vector<8x8xf32>,
    return
  }
  func.func @transform_0(%arg0: i32) -> (i32, i32) {
    %c0_i32 = arith.constant 0 : i32
    %c0_i32_0 = arith.constant 0 : i32
    return %c0_i32, %arg0 : i32, i32
  }
  func.func @transform_1(%arg0: i32) -> (i32, i32) {
    %c0_i32 = arith.constant 0 : i32
    %c0_i32_0 = arith.constant 0 : i32
    %c0_i32_1 = arith.constant 0 : i32
    return %c0_i32, %c0_i32_0 : i32, i32
  }
}

</mosaic_0001>

<bundles_post_ra>
// kernel: cka_loss.2
= control target key start
LH: loop header
LB: loop body
LE: loop exit
PB: predicated region body
PF: predicated region fallthrough
CT: control target
= control target key end

     0   :  { %v265_v1 = vmov 8.0   ;;  %vm12_vm1 = vcmask 64512   ;;  %s352_s0 = inlined_call_operand.vmem [shape: f32[8,1024], index: 0, kind: input, shape index: {}]   ;;  %s353_s1 = inlined_call_operand.vmem [shape: f32[8,8], index: 1, kind: output, shape index: {}]  }
   0x1   :  { %v280_v0 = vld [vmem:[%s352_s0 + $0x10] sm:$0xff]  ;;  %263 = vrcp.f32 %v265_v1  ;;  %v285_v2 = vld [vmem:[%s352_s0] sm:$0xff]  ;;  %v290_v3 = vld [vmem:[%s352_s0 + $0x8] sm:$0xff] }
   0x2   :  { %v34_v4 = vrot.slane %v280_v0, 4  ;;  %v22_v5 = vrot.slane %v285_v2, 4  ;;  %v28_v6 = vrot.slane %v290_v3, 4  ;;  %v298_v7 = vld [vmem:[%s352_s0 + $0x18] sm:$0xff]  ;;  %v303_v8 = vld [vmem:[%s352_s0 + $0x30] sm:$0xff]  ;;  %v308_v9 = vld [vmem:[%s352_s0 + $0x20] sm:$0xff] }
   0x3   :  { %v40_v10 = vrot.slane %v298_v7, 4  ;;  %v58_v11 = vrot.slane %v303_v8, 4  ;;  %v46_v12 = vrot.slane %v308_v9, 4  ;;  %v316_v13 = vld [vmem:[%s352_s0 + $0x38] sm:$0xff]  ;;  %v321_v14 = vld [vmem:[%s352_s0 + $0x28] sm:$0xff] }
   0x4   :  { %v35_v15 = vadd.f32 %v34_v4, %v280_v0  ;;  %v23_v16 = vadd.f32 %v22_v5, %v285_v2  ;;  %v29_v17 = vadd.f32 %v28_v6, %v290_v3  ;;  %v64_v18 = vrot.slane %v316_v13, 4 }
   0x5   :  { %v41_v19 = vadd.f32 %v40_v10, %v298_v7  ;;  %v59_v20 = vadd.f32 %v58_v11, %v303_v8  ;;  %v47_v21 = vadd.f32 %v46_v12, %v308_v9  ;;  %v52_v22 = vrot.slane %v321_v14, 4 }
   0x6   :  { %v36_v23 = vrot.slane %v35_v15, 2  ;;  %v24_v24 = vrot.slane %v23_v16, 2  ;;  %v30_v25 = vrot.slane %v29_v17, 2  ;;  %v65_v26 = vadd.f32 %v64_v18, %v316_v13 }
   0x7   :  { %v264_v27 = vpop.eup %263  ;;  %v42_v28 = vrot.slane %v41_v19, 2  ;;  %v60_v29 = vrot.slane %v59_v20, 2  ;;  %v48_v30 = vrot.slane %v47_v21, 2  ;;  %v53_v34 = vadd.f32 %v52_v22, %v321_v14 }
   0x8   :  { %v37_v31 = vadd.f32 %v36_v23, %v35_v15  ;;  %v71_v32 = vmul.f32 8.0, %v264_v27  ;;  %v25_v33 = vadd.f32 %v24_v24, %v23_v16  ;;  %v31_v35 = vadd.f32 %v30_v25, %v29_v17 }
   0x9   :  { %v43_v36 = vadd.f32 %v42_v28, %v41_v19  ;;  %v61_v37 = vadd.f32 %v60_v29, %v59_v20  ;;  %v49_v38 = vadd.f32 %v48_v30, %v47_v21  ;;  %v66_v42 = vrot.slane %v65_v26, 2 }
   0xa   :  { %v38_v39 = vrot.slane %v37_v31, 1  ;;  %v72_v40 = vsub.f32 1.0, %v71_v32  ;;  %v26_v41 = vrot.slane %v25_v33, 1  ;;  %v32_v43 = vrot.slane %v31_v35, 1 }
   0xb   :  { %v44_v44 = vrot.slane %v43_v36, 1  ;;  %v62_v45 = vrot.slane %v61_v37, 1  ;;  %v50_v46 = vrot.slane %v49_v38, 1  ;;  %vm75_vm0 = vweird.f32 %v264_v27 }
   0xc   :  { %v39_v47 = vadd.f32 %v38_v39, %v37_v31  ;;  %v73_v48 = vmul.f32 %v264_v27, %v72_v40  ;;  %v67_v49 = vadd.f32 %v66_v42, %v65_v26  ;;  %v27_v50 = vadd.f32 %v26_v41, %v25_v33 }
   0xd   :  { %v33_v51 = vadd.f32 %v32_v43, %v31_v35  ;;  %v45_v52 = vadd.f32 %v44_v44, %v43_v36  ;;  %v63_v53 = vadd.f32 %v62_v45, %v61_v37  ;;  %v51_v55 = vadd.f32 %v50_v46, %v49_v38 }
   0xe   :  { %v74_v54 = vadd.f32 %v264_v27, %v73_v48  ;;  %v68_v56 = vrot.slane %v67_v49, 1  ;;  %v54_v57 = vrot.slane %v53_v34, 2 }
  0x10   :  { %v76_v58 = vsel %vm75_vm0, %v264_v27, %v74_v54  ;;  %v69_v59 = vadd.f32 %v68_v56, %v67_v49  ;;  %v55_v60 = vadd.f32 %v54_v57, %v53_v34 }
  0x11   :  { %v79_v61 = vmul.f32 %v76_v58, %v39_v47  ;;  %v77_v62 = vmul.f32 %v76_v58, %v27_v50  ;;  %v78_v63 = vmul.f32 %v76_v58, %v33_v51  ;;  %v80_v1 = vmul.f32 %v76_v58, %v45_v52 }
  0x12   :  { %v83_v4 = vmul.f32 %v76_v58, %v63_v53  ;;  %v81_v5 = vmul.f32 %v76_v58, %v51_v55  ;;  %v84_v6 = vmul.f32 %v76_v58, %v69_v59  ;;  %v56_v10 = vrot.slane %v55_v60, 1 }
  0x13   :  { %v87_v11 = vsub.f32 %v280_v0, %v79_v61  ;;  %v85_v12 = vsub.f32 %v285_v2, %v77_v62  ;;  %v86_v15 = vsub.f32 %v290_v3, %v78_v63  ;;  %v88_v16 = vsub.f32 %v298_v7, %v80_v1 }
  0x14   :  { %v91_v17 = vsub.f32 %v303_v8, %v83_v4  ;;  %v89_v18 = vsub.f32 %v308_v9, %v81_v5  ;;  %v57_v19 = vadd.f32 %v56_v10, %v55_v60  ;;  %v92_v20 = vsub.f32 %v316_v13, %v84_v6 }
  0x15   :  { %149 = vmatpush.xpose.msra.mxu2 %v87_v11  ;;  %109 = vmatpush.xpose.msra.mxu0 %v85_v12  ;;  %v266_v2 = vmov 0.0  }
  0x16   :  { %129 = vmatpush.xpose.msra.mxu1 %v86_v15  ;;  %169 = vmatpush.xpose.msra.mxu3 %v88_v16  ;;  %v82_v21 = vmul.f32 %v76_v58, %v57_v19  ;;  %13 = vst.msk [vmem:[%s353_s1] sm:$0xff] %vm12_vm1, %v266_v2 }
  0x18   :  { %150 = vmatmul.f32.vlgmr.msra.gmra.mxu2 %v87_v11  ;;  %110 = vmatmul.f32.vlgmr.msra.gmra.mxu0 %v85_v12  ;;  %v90_v0 = vsub.f32 %v321_v14, %v82_v21 }
  0x19   :  { %229 = vmatpush.xpose.msrb.mxu2 %v91_v17  ;;  %189 = vmatpush.xpose.msrb.mxu0 %v89_v18 }
  0x1a   :  { %130 = vmatmul.f32.vlgmr.msra.gmra.mxu1 %v86_v15  ;;  %170 = vmatmul.f32.vlgmr.msra.gmra.mxu3 %v88_v16 }
  0x1b   :  { %249 = vmatpush.xpose.msrb.mxu3 %v92_v20  ;;  %209 = vmatpush.xpose.msrb.mxu1 %v90_v0 }
  0x1d   :  { %v93_v30 = vld [vmem:[%s353_s1] sm:$0xff] }
  0x20   :  { %230 = vmatmul.f32.vlgmr.msrb.gmra.mxu2 %v91_v17  ;;  %190 = vmatmul.f32.vlgmr.msrb.gmra.mxu0 %v89_v18 }
  0x22   :  { %250 = vmatmul.f32.vlgmr.msrb.gmra.mxu3 %v92_v20  ;;  %210 = vmatmul.f32.vlgmr.msrb.gmra.mxu1 %v90_v0 }
  0x95   :  { %v111_v3 = vpop.f32.mrf.mxu0 }
  0x97   :  { %v131_v7 = vpop.f32.mrf.mxu1 }
  0x98   :  { %v132_v8 = vadd.f32 %v131_v7, %v111_v3 }
  0x9b   :  { %v151_v9 = vpop.f32.mrf.mxu2 }
  0x9c   :  { %v152_v13 = vadd.f32 %v151_v9, %v132_v8 }
  0x9d   :  { %v171_v14 = vpop.f32.mrf.mxu3  ;;  %v191_v22 = vpop.f32.mrf.mxu0 }
  0x9e   :  { %v172_v23 = vadd.f32 %v171_v14, %v152_v13 }
  0x9f   :  { %v211_v24 = vpop.f32.mrf.mxu1 }
  0xa0   :  { %v192_v25 = vadd.f32 %v191_v22, %v172_v23 }
  0xa2   :  { %v212_v26 = vadd.f32 %v211_v24, %v192_v25 }
  0xa3   :  { %v231_v27 = vpop.f32.mrf.mxu2 }
  0xa4   :  { %v232_v28 = vadd.f32 %v231_v27, %v212_v26 }
  0xa5   :  { %v251_v29 = vpop.f32.mrf.mxu3 }
  0xa6   :  { %v252_v31 = vadd.f32 %v251_v29, %v232_v28 }
  0xa8   :  { %v254_v32 = vadd.f32 %v252_v31, %v93_v30 }
  0xaa   :  { %256 = vst.msk [vmem:[%s353_s1] sm:$0xff] %vm12_vm1, %v254_v32 }

// kernel: cka_loss.3
= control target key start
LH: loop header
LB: loop body
LE: loop exit
PB: predicated region body
PF: predicated region fallthrough
CT: control target
= control target key end

     0   :  { %v497_v1 = vmov 8.0   ;;  %vm12_vm1 = vcmask 64512   ;;  %s671_s0 = inlined_call_operand.vmem [shape: f32[8,2048], index: 0, kind: input, shape index: {}]   ;;  %s672_s1 = inlined_call_operand.vmem [shape: f32[8,8], index: 1, kind: output, shape index: {}]  }
   0x1   :  { %v512_v0 = vld [vmem:[%s671_s0 + $0x10] sm:$0xff]  ;;  %495 = vrcp.f32 %v497_v1  ;;  %v517_v2 = vld [vmem:[%s671_s0] sm:$0xff]  ;;  %v522_v3 = vld [vmem:[%s671_s0 + $0x8] sm:$0xff] }
   0x2   :  { %v42_v4 = vrot.slane %v512_v0, 4  ;;  %v30_v5 = vrot.slane %v517_v2, 4  ;;  %v36_v6 = vrot.slane %v522_v3, 4  ;;  %v530_v7 = vld [vmem:[%s671_s0 + $0x18] sm:$0xff]  ;;  %v535_v8 = vld [vmem:[%s671_s0 + $0x30] sm:$0xff]  ;;  %v540_v9 = vld [vmem:[%s671_s0 + $0x20] sm:$0xff] }
   0x3   :  { %v48_v10 = vrot.slane %v530_v7, 4  ;;  %v66_v11 = vrot.slane %v535_v8, 4  ;;  %v54_v12 = vrot.slane %v540_v9, 4  ;;  %v548_v13 = vld [vmem:[%s671_s0 + $0x38] sm:$0xff]  ;;  %v553_v14 = vld [vmem:[%s671_s0 + $0x28] sm:$0xff]  ;;  %v568_v47 = vld [vmem:[%s671_s0 + $0x50] sm:$0xff] }
   0x4   :  { %v43_v15 = vadd.f32 %v42_v4, %v512_v0  ;;  %v31_v16 = vadd.f32 %v30_v5, %v517_v2  ;;  %v37_v17 = vadd.f32 %v36_v6, %v522_v3  ;;  %v72_v18 = vrot.slane %v548_v13, 4  ;;  %v573_v48 = vld [vmem:[%s671_s0 + $0x40] sm:$0xff]  ;;  %v578_v53 = vld [vmem:[%s671_s0 + $0x58] sm:$0xff]  ;;  %v583_v54 = vld [vmem:[%s671_s0 + $0x48] sm:$0xff] }
   0x5   :  { %v49_v19 = vadd.f32 %v48_v10, %v530_v7  ;;  %v67_v20 = vadd.f32 %v66_v11, %v535_v8  ;;  %v55_v21 = vadd.f32 %v54_v12, %v540_v9  ;;  %v60_v22 = vrot.slane %v553_v14, 4  ;;  %v588_v55 = vld [vmem:[%s671_s0 + $0x70] sm:$0xff] }
   0x6   :  { %v44_v23 = vrot.slane %v43_v15, 2  ;;  %v32_v24 = vrot.slane %v31_v16, 2  ;;  %v38_v25 = vrot.slane %v37_v17, 2  ;;  %v73_v26 = vadd.f32 %v72_v18, %v548_v13 }
   0x7   :  { %v496_v27 = vpop.eup %495  ;;  %v50_v28 = vrot.slane %v49_v19, 2  ;;  %v68_v29 = vrot.slane %v67_v20, 2  ;;  %v56_v30 = vrot.slane %v55_v21, 2  ;;  %v61_v31 = vadd.f32 %v60_v22, %v553_v14 }
   0x8   :  { %v45_v32 = vadd.f32 %v44_v23, %v43_v15  ;;  %v127_v33 = vmul.f32 8.0, %v496_v27  ;;  %vm131_vm0 = vweird.f32 %v496_v27  ;;  %v33_v34 = vadd.f32 %v32_v24, %v31_v16 }
   0x9   :  { %v39_v35 = vadd.f32 %v38_v25, %v37_v17  ;;  %v51_v36 = vadd.f32 %v50_v28, %v49_v19  ;;  %v69_v37 = vadd.f32 %v68_v29, %v67_v20  ;;  %v57_v38 = vadd.f32 %v56_v30, %v55_v21  ;;  %v613_v28 = vld [vmem:[%s671_s0 + $0x60] sm:$0xff]  ;;  %v618_v29 = vld [vmem:[%s671_s0 + $0x78] sm:$0xff] }
   0xa   :  { %v46_v39 = vrot.slane %v45_v32, 1  ;;  %v128_v40 = vsub.f32 1.0, %v127_v33  ;;  %v34_v41 = vrot.slane %v33_v34, 1  ;;  %v74_v42 = vrot.slane %v73_v26, 2 }
   0xb   :  { %v40_v43 = vrot.slane %v39_v35, 1  ;;  %v52_v44 = vrot.slane %v51_v36, 1  ;;  %v70_v45 = vrot.slane %v69_v37, 1  ;;  %v58_v46 = vrot.slane %v57_v38, 1 }
   0xc   :  { %v47_v49 = vadd.f32 %v46_v39, %v45_v32  ;;  %v129_v50 = vmul.f32 %v496_v27, %v128_v40  ;;  %v35_v51 = vadd.f32 %v34_v41, %v33_v34  ;;  %v75_v52 = vadd.f32 %v74_v42, %v73_v26  ;;  %v635_v39 = vld [vmem:[%s671_s0 + $0x68] sm:$0xff] }
   0xd   :  { %v41_v56 = vadd.f32 %v40_v43, %v39_v35  ;;  %v53_v57 = vadd.f32 %v52_v44, %v51_v36  ;;  %v71_v58 = vadd.f32 %v70_v45, %v69_v37  ;;  %v59_v59 = vadd.f32 %v58_v46, %v57_v38 }
   0xe   :  { %v130_v60 = vadd.f32 %v496_v27, %v129_v50  ;;  %v76_v61 = vrot.slane %v75_v52, 1  ;;  %v62_v62 = vrot.slane %v61_v31, 2  ;;  %v90_v63 = vrot.slane %v568_v47, 4 }
   0xf   :  { %v78_v1 = vrot.slane %v573_v48, 4  ;;  %v96_v4 = vrot.slane %v578_v53, 4  ;;  %v84_v5 = vrot.slane %v583_v54, 4  ;;  %v114_v6 = vrot.slane %v588_v55, 4 }
  0x10   :  { %v596_v10 = vsel %vm131_vm0, %v496_v27, %v130_v60  ;;  %v77_v11 = vadd.f32 %v76_v61, %v75_v52  ;;  %v63_v12 = vadd.f32 %v62_v62, %v61_v31  ;;  %v91_v15 = vadd.f32 %v90_v63, %v568_v47 }
  0x11   :  { %v135_v16 = vmul.f32 %v596_v10, %v47_v49  ;;  %v133_v17 = vmul.f32 %v596_v10, %v35_v51  ;;  %v134_v18 = vmul.f32 %v596_v10, %v41_v56  ;;  %v136_v19 = vmul.f32 %v596_v10, %v53_v57 }
  0x12   :  { %v139_v20 = vmul.f32 %v596_v10, %v71_v58  ;;  %v137_v21 = vmul.f32 %v596_v10, %v59_v59  ;;  %v140_v22 = vmul.f32 %v596_v10, %v77_v11  ;;  %v64_v23 = vrot.slane %v63_v12, 1 }
  0x13   :  { %v151_v24 = vsub.f32 %v512_v0, %v135_v16  ;;  %v149_v25 = vsub.f32 %v517_v2, %v133_v17  ;;  %v150_v26 = vsub.f32 %v522_v3, %v134_v18  ;;  %v152_v27 = vsub.f32 %v530_v7, %v136_v19 }
  0x14   :  { %v155_v30 = vsub.f32 %v535_v8, %v139_v20  ;;  %v153_v0 = vsub.f32 %v540_v9, %v137_v21  ;;  %v623_v2 = vsub.f32 %v548_v13, %v140_v22  ;;  %v65_v3 = vadd.f32 %v64_v23, %v63_v12 }
  0x15   :  { %221 = vmatpush.xpose.msra.mxu2 %v151_v24  ;;  %181 = vmatpush.xpose.msra.mxu0 %v149_v25  ;;  %v92_v7 = vrot.slane %v91_v15, 2  ;;  %v79_v31 = vadd.f32 %v78_v1, %v573_v48  ;;  %v97_v32 = vadd.f32 %v96_v4, %v578_v53  ;;  %v85_v33 = vadd.f32 %v84_v5, %v583_v54 }
  0x16   :  { %201 = vmatpush.xpose.msra.mxu1 %v150_v26  ;;  %241 = vmatpush.xpose.msra.mxu3 %v152_v27  ;;  %v138_v34 = vmul.f32 %v596_v10, %v65_v3  ;;  %v115_v8 = vadd.f32 %v114_v6, %v588_v55  ;;  %v102_v9 = vrot.slane %v613_v28, 4  ;;  %v120_v13 = vrot.slane %v618_v29, 4 }
  0x17   :  { %v93_v35 = vadd.f32 %v92_v7, %v91_v15  ;;  %v80_v36 = vrot.slane %v79_v31, 2  ;;  %v98_v37 = vrot.slane %v97_v32, 2  ;;  %v86_v38 = vrot.slane %v85_v33, 2 }
  0x18   :  { %222 = vmatmul.f32.vlgmr.msra.gmra.mxu2 %v151_v24  ;;  %182 = vmatmul.f32.vlgmr.msra.gmra.mxu0 %v149_v25  ;;  %v154_v40 = vsub.f32 %v553_v14, %v138_v34  ;;  %v116_v41 = vrot.slane %v115_v8, 2  ;;  %v103_v42 = vadd.f32 %v102_v9, %v613_v28  ;;  %v121_v43 = vadd.f32 %v120_v13, %v618_v29 }
  0x19   :  { %301 = vmatpush.xpose.msrb.mxu2 %v155_v30  ;;  %261 = vmatpush.xpose.msrb.mxu0 %v153_v0  ;;  %v94_v44 = vrot.slane %v93_v35, 1  ;;  %v81_v45 = vadd.f32 %v80_v36, %v79_v31  ;;  %v99_v46 = vadd.f32 %v98_v37, %v97_v32  ;;  %v87_v49 = vadd.f32 %v86_v38, %v85_v33 }
  0x1a   :  { %202 = vmatmul.f32.vlgmr.msra.gmra.mxu1 %v150_v26  ;;  %242 = vmatmul.f32.vlgmr.msra.gmra.mxu3 %v152_v27  ;;  %v117_v50 = vadd.f32 %v116_v41, %v115_v8  ;;  %v104_v51 = vrot.slane %v103_v42, 2  ;;  %v122_v52 = vrot.slane %v121_v43, 2  ;;  %v108_v56 = vrot.slane %v635_v39, 4 }
  0x1b   :  { %321 = vmatpush.xpose.msrb.mxu3 %v623_v2  ;;  %281 = vmatpush.xpose.msrb.mxu1 %v154_v40  ;;  %v95_v14 = vadd.f32 %v94_v44, %v93_v35  ;;  %v82_v57 = vrot.slane %v81_v45, 1  ;;  %v100_v58 = vrot.slane %v99_v46, 1  ;;  %v88_v59 = vrot.slane %v87_v49, 1 }
  0x1c   :  { %v118_v60 = vrot.slane %v117_v50, 1  ;;  %v105_v61 = vadd.f32 %v104_v51, %v103_v42  ;;  %v123_v62 = vadd.f32 %v122_v52, %v121_v43  ;;  %v109_v63 = vadd.f32 %v108_v56, %v635_v39 }
  0x1d   :  { %v143_v1 = vmul.f32 %v596_v10, %v95_v14  ;;  %v83_v4 = vadd.f32 %v82_v57, %v81_v45  ;;  %v101_v5 = vadd.f32 %v100_v58, %v99_v46  ;;  %v89_v6 = vadd.f32 %v88_v59, %v87_v49 }
  0x1e   :  { %v119_v11 = vadd.f32 %v118_v60, %v117_v50  ;;  %v106_v12 = vrot.slane %v105_v61, 1  ;;  %v124_v15 = vrot.slane %v123_v62, 1  ;;  %v110_v16 = vrot.slane %v109_v63, 2 }
  0x1f   :  { %v159_v17 = vsub.f32 %v568_v47, %v143_v1  ;;  %v141_v18 = vmul.f32 %v596_v10, %v83_v4  ;;  %v144_v19 = vmul.f32 %v596_v10, %v101_v5  ;;  %v142_v20 = vmul.f32 %v596_v10, %v89_v6 }
  0x20   :  { %302 = vmatmul.f32.vlgmr.msrb.gmra.mxu2 %v155_v30  ;;  %262 = vmatmul.f32.vlgmr.msrb.gmra.mxu0 %v153_v0  ;;  %v147_v21 = vmul.f32 %v596_v10, %v119_v11  ;;  %v107_v22 = vadd.f32 %v106_v12, %v105_v61  ;;  %v125_v23 = vadd.f32 %v124_v15, %v123_v62 }
  0x21   :  { %381 = vmatpush.xpose.msra.mxu2 %v159_v17  ;;  %v157_v24 = vsub.f32 %v573_v48, %v141_v18  ;;  %v160_v25 = vsub.f32 %v578_v53, %v144_v19  ;;  %v158_v47 = vsub.f32 %v583_v54, %v142_v20  ;;  %v111_v0 = vadd.f32 %v110_v16, %v109_v63 }
  0x22   :  { %322 = vmatmul.f32.vlgmr.msrb.gmra.mxu3 %v623_v2  ;;  %282 = vmatmul.f32.vlgmr.msrb.gmra.mxu1 %v154_v40  ;;  %v163_v26 = vsub.f32 %v588_v55, %v147_v21  ;;  %v145_v27 = vmul.f32 %v596_v10, %v107_v22  ;;  %v148_v30 = vmul.f32 %v596_v10, %v125_v23 }
  0x23   :  { %341 = vmatpush.xpose.msra.mxu0 %v157_v24  ;;  %401 = vmatpush.xpose.msra.mxu3 %v160_v25  ;;  %v112_v3 = vrot.slane %v111_v0, 1 }
  0x24   :  { %361 = vmatpush.xpose.msra.mxu1 %v158_v47  ;;  %v161_v2 = vsub.f32 %v613_v28, %v145_v27  ;;  %v164_v48 = vsub.f32 %v618_v29, %v148_v30  ;;  %v498_v28 = vmov 0.0  }
  0x25   :  { %461 = vmatpush.xpose.msrb.mxu2 %v163_v26  ;;  %v113_v53 = vadd.f32 %v112_v3, %v111_v0  ;;  %13 = vst.msk [vmem:[%s672_s1] sm:$0xff] %vm12_vm1, %v498_v28 }
  0x27   :  { %421 = vmatpush.xpose.msrb.mxu0 %v161_v2  ;;  %481 = vmatpush.xpose.msrb.mxu3 %v164_v48  ;;  %v146_v54 = vmul.f32 %v596_v10, %v113_v53 }
  0x28   :  { %382 = vmatmul.f32.vlgmr.msra.gmra.mxu2 %v159_v17  ;;  %342 = vmatmul.f32.vlgmr.msra.gmra.mxu0 %v157_v24 }
  0x29   :  { %v162_v55 = vsub.f32 %v635_v39, %v146_v54 }
  0x2a   :  { %402 = vmatmul.f32.vlgmr.msra.gmra.mxu3 %v160_v25  ;;  %362 = vmatmul.f32.vlgmr.msra.gmra.mxu1 %v158_v47 }
  0x2b   :  { %441 = vmatpush.xpose.msrb.mxu1 %v162_v55 }
  0x2c   :  { %v165_v59 = vld [vmem:[%s672_s1] sm:$0xff] }
  0x30   :  { %462 = vmatmul.f32.vlgmr.msrb.gmra.mxu2 %v163_v26  ;;  %422 = vmatmul.f32.vlgmr.msrb.gmra.mxu0 %v161_v2 }
  0x32   :  { %482 = vmatmul.f32.vlgmr.msrb.gmra.mxu3 %v164_v48  ;;  %442 = vmatmul.f32.vlgmr.msrb.gmra.mxu1 %v162_v55 }
  0x95   :  { %v183_v29 = vpop.f32.mrf.mxu0 }
  0x97   :  { %v203_v7 = vpop.f32.mrf.mxu1 }
  0x98   :  { %v204_v31 = vadd.f32 %v203_v7, %v183_v29 }
  0x9b   :  { %v223_v10 = vpop.f32.mrf.mxu2 }
  0x9c   :  { %v224_v32 = vadd.f32 %v223_v10, %v204_v31 }
  0x9d   :  { %v243_v33 = vpop.f32.mrf.mxu3  ;;  %v263_v34 = vpop.f32.mrf.mxu0 }
  0x9e   :  { %v244_v8 = vadd.f32 %v243_v33, %v224_v32 }
  0x9f   :  { %v283_v9 = vpop.f32.mrf.mxu1 }
  0xa0   :  { %v264_v13 = vadd.f32 %v263_v34, %v244_v8 }
  0xa2   :  { %v284_v35 = vadd.f32 %v283_v9, %v264_v13 }
  0xa3   :  { %v303_v36 = vpop.f32.mrf.mxu2 }
  0xa4   :  { %v304_v37 = vadd.f32 %v303_v36, %v284_v35 }
  0xa5   :  { %v323_v38 = vpop.f32.mrf.mxu3  ;;  %v343_v39 = vpop.f32.mrf.mxu0 }
  0xa6   :  { %v324_v40 = vadd.f32 %v323_v38, %v304_v37 }
  0xa7   :  { %v363_v41 = vpop.f32.mrf.mxu1 }
  0xa8   :  { %v344_v42 = vadd.f32 %v343_v39, %v324_v40 }
  0xaa   :  { %v364_v43 = vadd.f32 %v363_v41, %v344_v42 }
  0xab   :  { %v383_v44 = vpop.f32.mrf.mxu2 }
  0xac   :  { %v384_v45 = vadd.f32 %v383_v44, %v364_v43 }
  0xad   :  { %v403_v46 = vpop.f32.mrf.mxu3  ;;  %v423_v49 = vpop.f32.mrf.mxu0 }
  0xae   :  { %v404_v50 = vadd.f32 %v403_v46, %v384_v45 }
  0xaf   :  { %v443_v51 = vpop.f32.mrf.mxu1 }
  0xb0   :  { %v424_v52 = vadd.f32 %v423_v49, %v404_v50 }
  0xb2   :  { %v444_v56 = vadd.f32 %v443_v51, %v424_v52 }
  0xb3   :  { %v463_v14 = vpop.f32.mrf.mxu2 }
  0xb4   :  { %v464_v57 = vadd.f32 %v463_v14, %v444_v56 }
  0xb5   :  { %v483_v58 = vpop.f32.mrf.mxu3 }
  0xb6   :  { %v484_v60 = vadd.f32 %v483_v58, %v464_v57 }
  0xb8   :  { %v486_v61 = vadd.f32 %v484_v60, %v165_v59 }
  0xba   :  { %488 = vst.msk [vmem:[%s672_s1] sm:$0xff] %vm12_vm1, %v486_v61 }

</bundles_post_ra>
